<compile_context>
chip_gen: v7x
topology: tpu7x:2x2x1
jax: 0.10.0
libtpu: 0.0.40
codegen_flags: <defaults>
</compile_context>

<pallas_src>
import functools

import jax
import jax.numpy as jnp
from jax import lax
from jax.experimental import pallas as pl
from jax.experimental.pallas import tpu as pltpu


def _sepconv_kernel(x_ref, wf_ref, bias_ref, o_ref, *scratch, kernel_size,
                    stride, dilation, padding, l_in, l_out, c_in, batch_tile):
    """One grid step processes `batch_tile` samples.

    x_ref    : (batch_tile, C_in, L_in)           unpadded input tile
    wf_ref   : (C_out, K*C_in)                    fused depthwise*pointwise weight
    bias_ref : (C_out, 1)                         fused bias  W_pw @ b_dw + b_pw
    o_ref    : (batch_tile, C_out, L_out)
    scratch  : [xpad (batch_tile, C_in, L_in+2p)] only when padding > 0
               col  (K*C_in, batch_tile*L_out)    im2col RHS for one MXU matmul
    """
    if padding > 0:
        xpad_ref, col_ref = scratch
        # In-kernel zero padding: VMEM-only, no host jnp.pad / HBM round trip.
        xpad_ref[...] = jnp.zeros_like(xpad_ref)
        xpad_ref[:, :, padding:padding + l_in] = x_ref[...]
        src = xpad_ref
    else:
        (col_ref,) = scratch
        src = x_ref

    # im2col: K dilated/strided taps stacked along sublanes, samples stacked
    # along lanes (each sample occupies a lane-aligned 128-multiple slab).
    # batch_tile is capped small (<=16) so this static unroll stays compact.
    for b in range(batch_tile):
        if stride == 1:
            xb = src[b]                                   # load sample once
        for k in range(kernel_size):
            start = k * dilation
            if stride == 1:
                tap = xb[:, start:start + l_out]          # (C_in, L_out)
            else:
                # Ref-level strided read keeps the stride on the load path.
                tap = src[b, :, pl.ds(start, l_out, stride=stride)]
            col_ref[k * c_in:(k + 1) * c_in, b * l_out:(b + 1) * l_out] = tap

    # Single MXU matmul for the whole tile + single bias broadcast.
    res = jnp.dot(wf_ref[...], col_ref[...], preferred_element_type=jnp.float32)
    res = res + bias_ref[...]                              # (C_out, bt*L_out)

    for b in range(batch_tile):
        o_ref[b] = res[:, b * l_out:(b + 1) * l_out].astype(o_ref.dtype)


def separable_conv1d(x, params, *, stride=1, padding=0, dilation=1,
                     batch_tile=None):
    B, C_in, L = x.shape
    x = x.astype(jnp.float32)
    w_dw = params["w_dw"].astype(jnp.float32)   # (C_in, K)   conv1.weight squeezed
    b_dw = params["b_dw"].astype(jnp.float32)   # (C_in,)
    w_pw = params["w_pw"].astype(jnp.float32)   # (C_out, C_in) pointwise.weight squeezed
    b_pw = params["b_pw"].astype(jnp.float32)   # (C_out,)
    K = w_dw.shape[1]
    C_out = w_pw.shape[0]
    L_out = (L + 2 * padding - dilation * (K - 1) - 1) // stride + 1
    assert L_out >= 1, "empty output length"
    L_pad = L + 2 * padding

    # Fold depthwise into pointwise (exact identity in f32):
    #   W_pw @ (dwconv(x) + b_dw) + b_pw == W_fused @ im2col(x) + (W_pw@b_dw + b_pw)
    # with W_fused[o, k*C_in + c] = W_pw[o, c] * W_dw[c, k].
    w_fused = jnp.einsum("oc,ck->okc", w_pw, w_dw).reshape(C_out, K * C_in)
    bias = w_pw @ b_dw.reshape(C_in, 1) + b_pw.reshape(C_out, 1)

    itemsize = 4  # f32
    if batch_tile is None:
        # Target ~2 MiB double-buffered (in+out) tiles, keep >=2 grid steps
        # whenever B>=2, cap the static unroll at 16 samples per step.
        per_sample = 2 * (C_in * L + C_out * L_out) * itemsize
        max_tile = max(1, min(16, (2 * 2**20) // max(per_sample, 1)))
        batch_tile = 1
        for t in range(1, B + 1):
            if B % t == 0 and t <= max_tile and B // t >= 2:
                batch_tile = t
    assert B % batch_tile == 0, "batch_tile must divide B"
    grid = (B // batch_tile,)

    # VMEM budget: double-buffered tiles + scratches, capped at 32 MiB
    # (safe scoped limit on v5e/v6e/v7x).
    tile_in = batch_tile * C_in * L * itemsize
    tile_out = batch_tile * C_out * L_out * itemsize
    w_bytes = (w_fused.size + bias.size) * itemsize
    scratch_bytes = (K * C_in) * (batch_tile * L_out) * itemsize
    if padding > 0:
        scratch_bytes += batch_tile * C_in * L_pad * itemsize
    need = 2 * (tile_in + tile_out + w_bytes) + scratch_bytes
    vmem_limit = int(min(32 * 2**20, max(16 * 2**20, 2 * need)))

    kernel = functools.partial(
        _sepconv_kernel, kernel_size=K, stride=stride, dilation=dilation,
        padding=padding, l_in=L, l_out=L_out, c_in=C_in, batch_tile=batch_tile)

    scratch_shapes = []
    if padding > 0:
        scratch_shapes.append(pltpu.VMEM((batch_tile, C_in, L_pad), jnp.float32))
    scratch_shapes.append(pltpu.VMEM((K * C_in, batch_tile * L_out), jnp.float32))

    grid_spec = pltpu.PrefetchScalarGridSpec(
        num_scalar_prefetch=0,
        grid=grid,
        in_specs=[
            pl.BlockSpec((batch_tile, C_in, L), lambda b: (b, 0, 0)),   # x
            pl.BlockSpec((C_out, K * C_in), lambda b: (0, 0)),          # fused weight
            pl.BlockSpec((C_out, 1), lambda b: (0, 0)),                 # fused bias
        ],
        out_specs=pl.BlockSpec((batch_tile, C_out, L_out), lambda b: (b, 0, 0)),
        scratch_shapes=scratch_shapes,
    )

    cost = pl.CostEstimate(
        flops=2 * B * C_out * C_in * K * L_out,
        transcendentals=0,
        bytes_accessed=(B * C_in * L + B * C_out * L_out
                        + w_fused.size + bias.size) * itemsize,
    )

    return pl.pallas_call(
        kernel,
        out_shape=jax.ShapeDtypeStruct((B, C_out, L_out), x.dtype),
        grid_spec=grid_spec,
        compiler_params=pltpu.CompilerParams(
            dimension_semantics=("parallel",),
            vmem_limit_bytes=vmem_limit),
        cost_estimate=cost,
    )(x, w_fused, bias)


def reference(x, params, *, stride=1, padding=0, dilation=1):
    """Independent pure-JAX reference (lax conv) mirroring the PyTorch forward."""
    C_in, K = params["w_dw"].shape
    C_out = params["w_pw"].shape[0]
    y = lax.conv_general_dilated(
        x, params["w_dw"].reshape(C_in, 1, K),
        window_strides=(stride,), padding=[(padding, padding)],
        rhs_dilation=(dilation,),
        dimension_numbers=("NCH", "OIH", "NCH"),
        feature_group_count=C_in,
        precision=lax.Precision.HIGHEST)
    y = y + params["b_dw"][None, :, None]
    z = lax.conv_general_dilated(
        y, params["w_pw"].reshape(C_out, C_in, 1),
        window_strides=(1,), padding=[(0, 0)],
        dimension_numbers=("NCH", "OIH", "NCH"),
        precision=lax.Precision.HIGHEST)
    return z + params["b_pw"][None, :, None]


if __name__ == "__main__":
    # Small demo shapes; L chosen so L_out = 128 (lane-dense output stores).
    B, C_in, C_out, K, L = 4, 8, 16, 3, 128
    stride, padding, dilation = 1, 1, 1

    key = jax.random.PRNGKey(0)
    kx, k1, k2, k3, k4 = jax.random.split(key, 5)
    x = jax.random.normal(kx, (B, C_in, L), jnp.float32)
    params = {
        "w_dw": jax.random.normal(k1, (C_in, K), jnp.float32) * 0.3,
        "b_dw": jax.random.normal(k2, (C_in,), jnp.float32) * 0.1,
        "w_pw": jax.random.normal(k3, (C_out, C_in), jnp.float32) * 0.3,
        "b_pw": jax.random.normal(k4, (C_out,), jnp.float32) * 0.1,
    }

    out = separable_conv1d(x, params, stride=stride, padding=padding,
                           dilation=dilation)
    out = jax.block_until_ready(out)

    ref = reference(x, params, stride=stride, padding=padding, dilation=dilation)
    assert out.shape == ref.shape == (B, C_out, L)
    assert jnp.allclose(out, ref, atol=1e-4, rtol=1e-4), "mismatch vs conv reference"
    print("KERNEL_OK")
</pallas_src>

<mosaic_0001>
module attributes {stable_mosaic.version = 11 : i64} {
  func.func @_sepconv_kernel(%arg0: i32, %arg1: memref<2x8x128xf32, #tpu.memory_space<vmem>>, %arg2: memref<16x24xf32, #tpu.memory_space<vmem>>, %arg3: memref<16x1xf32, #tpu.memory_space<vmem>>, %arg4: memref<2x16x128xf32, #tpu.memory_space<vmem>>, %arg5: memref<2x8x130xf32, #tpu.memory_space<vmem>>, %arg6: memref<24x256xf32, #tpu.memory_space<vmem>>) attributes {dimension_semantics = [#tpu.dimension_semantics<parallel>], iteration_bounds = array<i64: 2>, scalar_prefetch = 0 : i64, scratch_operands = 2 : i64, tpu.core_type = #tpu.core_type<tc>, window_params = [{transform_indices = @transform_0, window_bounds = array<i64: 2, 8, 128>}, {pipeline_mode = #tpu.pipeline_mode<synchronous>, transform_indices = @transform_1, window_bounds = array<i64: 16, 24>}, {pipeline_mode = #tpu.pipeline_mode<synchronous>, transform_indices = @transform_2, window_bounds = array<i64: 16, 1>}, {transform_indices = @transform_3, window_bounds = array<i64: 2, 16, 128>}]} {
    %cst = arith.constant 0.000000e+00 : f32
    %0 = vector.broadcast %cst : f32 to vector<2x8x130xf32>
    %c0 = arith.constant 0 : index
    %c0_0 = arith.constant 0 : index
    %c0_1 = arith.constant 0 : index
    %1 = vector.load %arg5[%c0, %c0_0, %c0_1] : memref<2x8x130xf32, #tpu.memory_space<vmem>>, vector<2x8x130xf32>
    tpu.vector_store %arg5[%c0, %c0_0, %c0_1], %0 {strides = array<i32>} : memref<2x8x130xf32, #tpu.memory_space<vmem>>, vector<2x8x130xf32>,
    %c0_2 = arith.constant 0 : index
    %c0_3 = arith.constant 0 : index
    %c0_4 = arith.constant 0 : index
    %2 = vector.load %arg1[%c0_2, %c0_3, %c0_4] : memref<2x8x128xf32, #tpu.memory_space<vmem>>, vector<2x8x128xf32>
    %c0_5 = arith.constant 0 : index
    %c0_6 = arith.constant 0 : index
    %c1 = arith.constant 1 : index
    %3 = vector.load %arg5[%c0_5, %c0_6, %c1] : memref<2x8x130xf32, #tpu.memory_space<vmem>>, vector<2x8x128xf32>
    tpu.vector_store %arg5[%c0_5, %c0_6, %c1], %2 {strides = array<i32>} : memref<2x8x130xf32, #tpu.memory_space<vmem>>, vector<2x8x128xf32>,
    %c0_7 = arith.constant 0 : index
    %c0_8 = arith.constant 0 : index
    %c0_9 = arith.constant 0 : index
    %4 = vector.load %arg5[%c0_7, %c0_8, %c0_9] : memref<2x8x130xf32, #tpu.memory_space<vmem>>, vector<1x8x130xf32>
    %5 = vector.shape_cast %4 : vector<1x8x130xf32> to vector<8x130xf32>
    %6 = vector.extract_strided_slice %5 {offsets = [0, 0], sizes = [8, 128], strides = [1, 1]} : vector<8x130xf32> to vector<8x128xf32>
    %c0_10 = arith.constant 0 : index
    %c0_11 = arith.constant 0 : index
    %7 = vector.load %arg6[%c0_10, %c0_11] : memref<24x256xf32, #tpu.memory_space<vmem>>, vector<8x128xf32>
    tpu.vector_store %arg6[%c0_10, %c0_11], %6 {strides = array<i32>} : memref<24x256xf32, #tpu.memory_space<vmem>>, vector<8x128xf32>,
    %8 = vector.extract_strided_slice %5 {offsets = [0, 1], sizes = [8, 128], strides = [1, 1]} : vector<8x130xf32> to vector<8x128xf32>
    %c8 = arith.constant 8 : index
    %c0_12 = arith.constant 0 : index
    %9 = vector.load %arg6[%c8, %c0_12] : memref<24x256xf32, #tpu.memory_space<vmem>>, vector<8x128xf32>
    tpu.vector_store %arg6[%c8, %c0_12], %8 {strides = array<i32>} : memref<24x256xf32, #tpu.memory_space<vmem>>, vector<8x128xf32>,
    %10 = vector.extract_strided_slice %5 {offsets = [0, 2], sizes = [8, 128], strides = [1, 1]} : vector<8x130xf32> to vector<8x128xf32>
    %c16 = arith.constant 16 : index
    %c0_13 = arith.constant 0 : index
    %11 = vector.load %arg6[%c16, %c0_13] : memref<24x256xf32, #tpu.memory_space<vmem>>, vector<8x128xf32>
    tpu.vector_store %arg6[%c16, %c0_13], %10 {strides = array<i32>} : memref<24x256xf32, #tpu.memory_space<vmem>>, vector<8x128xf32>,
    %c1_14 = arith.constant 1 : index
    %c0_15 = arith.constant 0 : index
    %c0_16 = arith.constant 0 : index
    %12 = vector.load %arg5[%c1_14, %c0_15, %c0_16] : memref<2x8x130xf32, #tpu.memory_space<vmem>>, vector<1x8x130xf32>
    %13 = vector.shape_cast %12 : vector<1x8x130xf32> to vector<8x130xf32>
    %14 = vector.extract_strided_slice %13 {offsets = [0, 0], sizes = [8, 128], strides = [1, 1]} : vector<8x130xf32> to vector<8x128xf32>
    %c0_17 = arith.constant 0 : index
    %c128 = arith.constant 128 : index
    %15 = vector.load %arg6[%c0_17, %c128] : memref<24x256xf32, #tpu.memory_space<vmem>>, vector<8x128xf32>
    tpu.vector_store %arg6[%c0_17, %c128], %14 {strides = array<i32>} : memref<24x256xf32, #tpu.memory_space<vmem>>, vector<8x128xf32>,
    %16 = vector.extract_strided_slice %13 {offsets = [0, 1], sizes = [8, 128], strides = [1, 1]} : vector<8x130xf32> to vector<8x128xf32>
    %c8_18 = arith.constant 8 : index
    %c128_19 = arith.constant 128 : index
    %17 = vector.load %arg6[%c8_18, %c128_19] : memref<24x256xf32, #tpu.memory_space<vmem>>, vector<8x128xf32>
    tpu.vector_store %arg6[%c8_18, %c128_19], %16 {strides = array<i32>} : memref<24x256xf32, #tpu.memory_space<vmem>>, vector<8x128xf32>,
    %18 = vector.extract_strided_slice %13 {offsets = [0, 2], sizes = [8, 128], strides = [1, 1]} : vector<8x130xf32> to vector<8x128xf32>
    %c16_20 = arith.constant 16 : index
    %c128_21 = arith.constant 128 : index
    %19 = vector.load %arg6[%c16_20, %c128_21] : memref<24x256xf32, #tpu.memory_space<vmem>>, vector<8x128xf32>
    tpu.vector_store %arg6[%c16_20, %c128_21], %18 {strides = array<i32>} : memref<24x256xf32, #tpu.memory_space<vmem>>, vector<8x128xf32>,
    %c0_22 = arith.constant 0 : index
    %c0_23 = arith.constant 0 : index
    %20 = vector.load %arg2[%c0_22, %c0_23] : memref<16x24xf32, #tpu.memory_space<vmem>>, vector<16x24xf32>
    %c0_24 = arith.constant 0 : index
    %c0_25 = arith.constant 0 : index
    %21 = vector.load %arg6[%c0_24, %c0_25] : memref<24x256xf32, #tpu.memory_space<vmem>>, vector<24x256xf32>
    %cst_26 = arith.constant dense<0.000000e+00> : vector<16x256xf32>
    %22 = tpu.matmul %20, %21, %cst_26 {dimension_numbers = #tpu.dot_dimension_numbers<[1], [0], [0], [1], [0, 0, 1, 1], [], []>} : vector<16x24xf32>, vector<24x256xf32>, vector<16x256xf32> -> vector<16x256xf32>
    %c0_27 = arith.constant 0 : index
    %c0_28 = arith.constant 0 : index
    %23 = vector.load %arg3[%c0_27, %c0_28] : memref<16x1xf32, #tpu.memory_space<vmem>>, vector<16x1xf32>
    %24 = vector.broadcast %23 : vector<16x1xf32> to vector<16x256xf32>
    %25 = arith.addf %22, %24 : vector<16x256xf32>
    %26 = vector.extract_strided_slice %25 {offsets = [0, 0], sizes = [16, 128], strides = [1, 1]} : vector<16x256xf32> to vector<16x128xf32>
    %c0_29 = arith.constant 0 : index
    %c0_30 = arith.constant 0 : index
    %c0_31 = arith.constant 0 : index
    %27 = vector.load %arg4[%c0_29, %c0_30, %c0_31] : memref<2x16x128xf32, #tpu.memory_space<vmem>>, vector<1x16x128xf32>
    %28 = vector.shape_cast %27 : vector<1x16x128xf32> to vector<16x128xf32>
    %29 = vector.shape_cast %26 : vector<16x128xf32> to vector<1x16x128xf32>
    tpu.vector_store %arg4[%c0_29, %c0_30, %c0_31], %29 {strides = array<i32>} : memref<2x16x128xf32, #tpu.memory_space<vmem>>, vector<1x16x128xf32>,
    %30 = vector.extract_strided_slice %25 {offsets = [0, 128], sizes = [16, 128], strides = [1, 1]} : vector<16x256xf32> to vector<16x128xf32>
    %c1_32 = arith.constant 1 : index
    %c0_33 = arith.constant 0 : index
    %c0_34 = arith.constant 0 : index
    %31 = vector.load %arg4[%c1_32, %c0_33, %c0_34] : memref<2x16x128xf32, #tpu.memory_space<vmem>>, vector<1x16x128xf32>
    %32 = vector.shape_cast %31 : vector<1x16x128xf32> to vector<16x128xf32>
    %33 = vector.shape_cast %30 : vector<16x128xf32> to vector<1x16x128xf32>
    tpu.vector_store %arg4[%c1_32, %c0_33, %c0_34], %33 {strides = array<i32>} : memref<2x16x128xf32, #tpu.memory_space<vmem>>, vector<1x16x128xf32>,
    return
  }
  func.func @transform_0(%arg0: i32) -> (i32, i32, i32) {
    %c0_i32 = arith.constant 0 : i32
    %c0_i32_0 = arith.constant 0 : i32
    %c0_i32_1 = arith.constant 0 : i32
    return %arg0, %c0_i32, %c0_i32_0 : i32, i32, i32
  }
  func.func @transform_1(%arg0: i32) -> (i32, i32) {
    %c0_i32 = arith.constant 0 : i32
    %c0_i32_0 = arith.constant 0 : i32
    %c0_i32_1 = arith.constant 0 : i32
    return %c0_i32, %c0_i32_0 : i32, i32
  }
  func.func @transform_2(%arg0: i32) -> (i32, i32) {
    %c0_i32 = arith.constant 0 : i32
    %c0_i32_0 = arith.constant 0 : i32
    %c0_i32_1 = arith.constant 0 : i32
    return %c0_i32, %c0_i32_0 : i32, i32
  }
  func.func @transform_3(%arg0: i32) -> (i32, i32, i32) {
    %c0_i32 = arith.constant 0 : i32
    %c0_i32_0 = arith.constant 0 : i32
    %c0_i32_1 = arith.constant 0 : i32
    return %arg0, %c0_i32, %c0_i32_0 : i32, i32, i32
  }
}

</mosaic_0001>

<bundles_post_ra>
// kernel: tpu_custom_call.1
= control target key start
LH: loop header
LB: loop body
LE: loop exit
PB: predicated region body
PF: predicated region fallthrough
CT: control target
= control target key end

     0   :  { %8 = vsyncpa [#allocation5], 0  ;;  %s851_s0 = inlined_call_operand.hbm [shape: f32[4,8,128], index: 0, kind: input, shape index: {}]   ;;  %s852_s1 = inlined_call_operand.vmem [shape: f32[16,24], index: 1, kind: input, shape index: {}]   ;;  %s853_s2 = inlined_call_operand.vmem [shape: f32[16,1], index: 2, kind: input, shape index: {}]   ;;  %s854_s3 = inlined_call_operand.hbm [shape: f32[4,16,128], index: 3, kind: output, shape index: {}]  }
   0x1   :  { %10 = vsyncpa [#allocation5 + $0x1], 0 }
   0x2   :  { %11 = vsyncpa [#allocation6], 0 }
   0x3   :  { %13 = vsyncpa [#allocation6 + $0x1], 0  ;;  %s676_s12 = smov 0   ;;  %s678_s13 = smov 0  }
   0x4   :  { %s680_s14 = smov 0   ;;  %s682_s15 = smov 0  }
   0x5 LB: > { %s697_s16 = sadd.s32 4294967295, %s643_s15   ;;  %s450_s17 = sadd.s32 4294967294, %s643_s15   ;;  %s643_s15 = sphi %s682_s15, %s867_s15   ;;  %s639_s14 = sphi %s680_s14, %s866_s14   ;;  %s635_s13 = sphi %s678_s13, %s865_s13   ;;  %s631_s12 = sphi %s676_s12, %s864_s12  }
   0x6   : > { %s701_s18 = sadd.s32 1, %s643_s15   ;;  %s26_s19 = sadd.s32 1, %s639_s14 }
   0x7   : > { %s23_s20 = ssub.s32 %s643_s15, %s701_s18  ;;  %p33_p0 = scmp.ne.s32.totalorder %s639_s14, %s635_s13 }
   0x8   : > { %p24_p1 = scmp.eq.s32.totalorder %s23_s20, 0  ;;  %p34_p2 = scmp.eq.s32.totalorder %s643_s15, 0 }
   0x9   : > { %p39_p3 = scmp.ne.s32.totalorder %s635_s13, %s631_s12  ;;  %p40_p4 = scmp.eq.s32.totalorder %s697_s16, 0 }
   0xa   : > { %s713_s21 = scalar_select %p24_p1, %s639_s14, %s26_s19  }
   0xb   : > { %p715_p5 = por %p34_p2, %p33_p0  ;;  %p719_p6 = por %p40_p4, %p39_p3 }
   0xc   : > { %p105_p7 = scmp.eq.s32.totalorder %s697_s16, 1  ;;  %p111_p8 = scmp.eq.s32.totalorder %s450_s17, 1 }
   0xd   : > { %p492_p10 = scmp.lt.s32.totalorder %s643_s15, 2  ;;  %s137_s26 = sand.u32 1, %s639_s14  }
   0xe   : > { %p726_p11 = por %p105_p7, %p33_p0  ;;  %p730_p12 = por %p111_p8, %p39_p3 }
   0xf   : > { %s469_s27 = sshll.u32 %s643_s15, 8  ;;  %s453_s28 = sshll.u32 %s137_s26, 4 }
  0x10   : > { %s858_s24 = scalar_select %p726_p11, 1, 0 }
  0x11   : > { %s859_s25 = scalar_select %p730_p12, 1, 0 }
  0x12   : > { %s739_s4 = scalar_lea.hbm %s851_s0, %s469_s27  ;;  %s141_s5 = scalar_lea.vmem [#allocation4], %s453_s28 }
  0x13   : > { %s148_s6 = sshll.u32 %s141_s5, 4  ;;  %p743_p13 = pnand %p492_p10, %p715_p5  ;;  %s747_s6 = int_to_ptr.vmem [resolvable:$true] %s148_s6 }
  0x14   : > { %s749_s8 = scalar_lea.sflag [#allocation5], %s137_s26  ;;  %s547_s9 = scalar_lea.hbm %s739_s4, 256 }
  0x15   : > { %p548_p0 = scmp.ne.s32.totalorder %s739_s4, %s547_s9  ;;  %p549_p1 = pneg %p743_p13 }
  0x16   : > { %s552_s17 = scalar_lea.hbm %s851_s0, 512  ;;  %p553_p4 = scmp.lt.u32.totalorder %s739_s4, %s851_s0 }
  0x17   : > { %p550_p2 = pnand %p549_p1, %p548_p0  ;;  %p554_p5 = scmp.lt.u32.totalorder %s552_s17, %s547_s9 }
  0x18   : > { %p556_p8 = scmp.lt.u32.totalorder %s547_s9, %s739_s4 }
  0x19   : > { %p551_p3 = pneg %p550_p2  ;;  %p555_p7 = por %p554_p5, %p553_p4 }
  0x1b   : > { %p557_p10 = por %p556_p8, %p555_p7 }
  0x1d   : > { %p558_p9 = pnand %p557_p10, %p551_p3 }
  0x1f   : > { %561 = shalt.err (!%p558_p9)
}
  0x20   : > { %s562_s22 = scalar_lea.vmem %s747_s6, 256  ;;  %s645_s26 = smov [#allocation4]  }
  0x21   : > { %p563_p0 = scmp.ne.s32.totalorder %s747_s6, %s562_s22  ;;  %s567_s27 = sshll.u32 %s645_s26, 4  ;;  %s568_s27 = int_to_ptr.vmem [resolvable:$false] %s567_s27 }
  0x22   : > { %s569_s28 = scalar_lea.vmem %s568_s27, 512  ;;  %p570_p11 = scmp.lt.s32.totalorder %s747_s6, %s568_s27 }
  0x23   : > { %p565_p2 = pnand %p563_p0, %p549_p1  ;;  %p571_p4 = scmp.lt.s32.totalorder %s569_s28, %s562_s22 }
  0x25   : > { %p566_p12 = pneg %p565_p2  ;;  %p572_p5 = por %p571_p4, %p570_p11 }
  0x27   : > { %p573_p7 = pnand %p572_p5, %p566_p12 }
  0x29   : > { %576 = shalt.err (!%p573_p7)
}
  0x2a   : > { %s646_s29 = smov 128   ;;  %s647_s30 = smov 8  }
  0x2b   : > { %487 = dma.hbm_to_vmem [thread:$0]  (!%p743_p13), %s739_s4, 256, %s747_s6, %s749_s8, %s646_s29, %s646_s29, %s647_s30  }
  0x2c   : > { %p456_p9 = scmp.ge.s32.totalorder %s643_s15, 1  ;;  %p156_p1 = scmp.lt.s32.totalorder %s643_s15, 3 }
  0x2e   : > { %p157_p3 = pnand %p456_p9, %p156_p1 }
  0x2f   : > { %s780_s5 = sand.u32 (!%p157_p3), 1, %s635_s13  }
  0x30   : > { %160 = sbr.rel (%p157_p3) target bundleno = 543 (0x21f), region = 32  ;;  %s457_s9 = sshll.u32 (!%p157_p3), %s780_s5, 4 }
  0x31   : > { %s163_s10 = scalar_lea.sflag (!%p157_p3), [#allocation5], %s780_s5  ;;  %s166_s11 = scalar_lea.vmem (!%p157_p3), [#allocation4], %s457_s9 }
  0x37   : > { %622 = dma.done.wait (%p719_p6), %s163_s10, 256  }
  0x38   : > { %624 = vsyncadd (%p719_p6), %s163_s10, 4294967040  ;;  %vm192_vm0 = vcmask 15360   ;;  %v648_v0 = vmov 0.0   ;;  %v197_v1 = vld [vmem:[%s166_s11 + $0x8] sm:$0xff]  ;;  %s649_s4 = smov 1   ;;  %v196_v2 = vld [vmem:[%s166_s11] sm:$0xff] }
  0x39   : > { %194 = vst [vmem:[#allocation2 + $0x10] sm:$0xff] %v648_v0  ;;  %195 = vst.msk [vmem:[#allocation2 + $0x18] sm:$0xff] %vm192_vm0, %v648_v0  ;;  %344 = vmatprep.mubr.f32.mxu0 %v648_v0  ;;  %350 = vmatprep.mubr.f32.mxu1 %v648_v0  ;;  %vm206_vm1 = vcmask 1047560   ;;  %vm208_vm2 = vcmask 7168   ;;  %s650_s23 = smov 126   ;;  %s651_s6 = smov 127  }
  0x3a   : > { %191 = vst [vmem:[#allocation2] sm:$0xff] %v648_v0  ;;  %193 = vst.msk [vmem:[#allocation2 + $0x8] sm:$0xff] %vm192_vm0, %v648_v0  ;;  %202 = vrot.lane.b32.xlu0 %v197_v1, %s649_s4  ;;  %v652_v11 = vmov 0   ;;  %v261_v12 = vld [vmem:[%s853_s2] sm:$0xff]  ;;  %v262_v13 = vld [vmem:[%s853_s2 + $0x8] sm:$0xff]  ;;  %vm221_vm3 = vcmask 1039360  }
  0x3b   : > { %546 = vset.pattern.permute.xlu1 %v652_v11  ;;  %545 = vset.pattern.permute.xlu0 %v652_v11  ;;  %vm229_vm4 = vcmask 1031168   ;;  %v253_v29 = vld [vmem:[%s852_s1] sm:$0xff]  ;;  %vm273_vm5 = vcmask 195584   ;;  %v254_v30 = vld [vmem:[%s852_s1 + $0x8] sm:$0xff]  ;;  %s458_s28 = sshll.u32 %s780_s5, 5  ;;  %s471_s9 = sshll.u32 %s697_s16, 9 }
  0x3c   : > { %s188_s29 = scalar_lea.vmem [#allocation7], %s458_s28  ;;  %s363_s16 = scalar_lea.sflag [#allocation6], %s780_s5 }
  0x3d   : > { %s377_s30 = sshll.u32 %s188_s29, 4  ;;  %p861_p11 = scmp.ne.s32.totalorder %s858_s24, 0  ;;  %s802_s30 = int_to_ptr.vmem [resolvable:$true] %s377_s30 }
  0x3e   : > { %200 = vrot.lane.b32.xlu0 %v196_v2, %s649_s4  ;;  %s807_s4 = scalar_lea.hbm %s854_s3, %s471_s9 }
  0xac   : > { %v203_v3 = vpop.permute.xlu0 %202 }
  0xad   : > { %210 = vst.msk [vmem:[#allocation2 + $0x10] sm:$0xff] %vm206_vm1, %v203_v3 }
  0xae   : > { %211 = vst.msk [vmem:[#allocation2 + $0x18] sm:$0xff] %vm208_vm2, %v203_v3 }
  0xb0   : > { %v201_v4 = vpop.permute.xlu0 %200 }
  0xb1   : > { %207 = vst.msk [vmem:[#allocation2] sm:$0xff] %vm206_vm1, %v201_v4 }
  0xb2   : > { %209 = vst.msk [vmem:[#allocation2 + $0x8] sm:$0xff] %vm208_vm2, %v201_v4 }
  0xb4   : > { %v234_v5 = vld [vmem:[#allocation2 + $0x10] sm:$0xff] }
  0xb5   : > { %v235_v6 = vld [vmem:[#allocation2 + $0x18] sm:$0xff]  ;;  %246 = vrot.lane.b32.xlu0 %v234_v5, %s650_s23 }
  0xb6   : > { %v535_v7 = vpack.i.bf16 %v235_v6, %v234_v5 }
  0xb8   : > { %536 = vrot.lane.b32.xlu1 %v535_v7, %s651_s6  ;;  %v212_v8 = vld [vmem:[#allocation2] sm:$0xff] }
  0xb9   : > { %v213_v9 = vld [vmem:[#allocation2 + $0x8] sm:$0xff]  ;;  %225 = vrot.lane.b32.xlu0 %v212_v8, %s650_s23 }
  0xba   : > { %v540_v10 = vpack.i.bf16 %v213_v9, %v212_v8 }
  0xbc   : > { %541 = vrot.lane.b32.xlu1 %v540_v10, %s651_s6  ;;  %s653_s6 = smov [#allocation7]  }
  0xbd   : > { %265 = vperm.xlu0 %545, %v261_v12   ;;  %s581_s7 = sshll.u32 %s653_s6, 4  ;;  %s582_s7 = int_to_ptr.vmem [resolvable:$false] %s581_s7 }
  0xbe   : > { %s583_s8 = scalar_lea.vmem %s582_s7, 1024  ;;  %p584_p8 = scmp.lt.s32.totalorder %s802_s30, %s582_s7 }
  0xc0   : > { %248 = vrot.lane.b32.xlu1 %v235_v6, %s650_s23 }
  0xc4   : > { %227 = vrot.lane.b32.xlu1 %v213_v9, %s650_s23  ;;  %s577_s23 = scalar_lea.vmem %s802_s30, 512 }
  0xc5   : > { %p578_p6 = scmp.ne.s32.totalorder %s802_s30, %s577_s23  ;;  %p585_p10 = scmp.lt.s32.totalorder %s583_s8, %s577_s23 }
  0xc7   : > { %p579_p12 = pnand %p578_p6, %p861_p11  ;;  %p586_p0 = por %p585_p10, %p584_p8 }
  0xc8   : > { %270 = vperm.xlu1 %546, %v262_v13  }
  0xc9   : > { %p580_p13 = pneg %p579_p12 }
  0xcb   : > { %p587_p2 = pnand %p586_p0, %p580_p13 }
 0x127   : > { %v247_v22 = vpop.permute.xlu0 %246 }
 0x12a   : > { %v537_v14 = vpop.permute.xlu1 %536 }
 0x12b   : > { %v539_v15 = vunpack.i.h.bf16 %v537_v14  ;;  %v538_v16 = vunpack.i.l.bf16 %v537_v14  ;;  %v226_v27 = vpop.permute.xlu0 %225 }
 0x12d   : > { %v243_v17 = vsel %vm221_vm3, %v538_v16, %v539_v15 }
 0x12e   : > { %v542_v18 = vpop.permute.xlu1 %541  ;;  %v472_v19 = vpack.c.bf16 %v243_v17, %v234_v5 }
 0x12f   : > { %v544_v20 = vunpack.i.h.bf16 %v542_v18  ;;  %v543_v21 = vunpack.i.l.bf16 %v542_v18 }
 0x130   : > { %473 = vmatprep.subr.bf16.mxu0 %v472_v19  ;;  %476 = vmatprep.subr.bf16.mxu1 %v472_v19 }
 0x131   : > { %v222_v23 = vsel %vm221_vm3, %v543_v21, %v544_v20 }
 0x132   : > { %v249_v24 = vpop.permute.xlu1 %248  ;;  %v474_v25 = vpack.c.bf16 %v222_v23, %v212_v8 }
 0x133   : > { %v250_v26 = vsel %vm229_vm4, %v247_v22, %v249_v24 }
 0x134   : > { %475 = vmatpush1.bf16.msra.mxu0 %v474_v25  ;;  %478 = vmatpush1.bf16.msra.mxu1 %v474_v25 }
 0x135   : > { %284 = vmatprep.subr.mxu0 %v250_v26  ;;  %477 = vmatprep.subr.mxu1 %v250_v26 }
 0x136   : > { %v228_v28 = vpop.permute.xlu1 %227 }
 0x137   : > { %v230_v31 = vsel %vm229_vm4, %v226_v27, %v228_v28 }
 0x138   : > { %285 = vmatpush1.msra.mxu0 %v230_v31  ;;  %479 = vmatpush1.msra.mxu1 %v230_v31 }
 0x139   : > { %459 = vmatmul.mubr.msk.f32.vlgmr.msra.gmra.mrb[0].mxu0 %vm273_vm5, %v253_v29  ;;  %460 = vmatmul.mubr.msk.f32.vlgmr.msra.gmra.mrb[0].mxu1 %vm273_vm5, %v254_v30 }
 0x13c   : > { %v266_v32 = vpop.permute.xlu0 %265 }
 0x147   : > { %v271_v33 = vpop.permute.xlu1 %270 }
 0x20c   : > { %v346_v34 = vpop.f32.mrb[0].mxu0  ;;  %v352_v35 = vpop.f32.mrb[0].mxu1 }
 0x20d   : > { %v347_v36 = vadd.f32 %v346_v34, %v266_v32  ;;  %v353_v37 = vadd.f32 %v352_v35, %v271_v33  ;;  %v348_v38 = vpop.f32.mrb[1].mxu0  ;;  %v354_v39 = vpop.f32.mrb[1].mxu1 }
 0x20e   : > { %v349_v40 = vadd.f32 %v348_v38, %v266_v32  ;;  %v355_v41 = vadd.f32 %v354_v39, %v271_v33 }
 0x20f   : > { %357 = vst [vmem:[%s188_s29] sm:$0xff] %v347_v36  ;;  %358 = vst [vmem:[%s188_s29 + $0x8] sm:$0xff] %v353_v37 }
 0x210   : > { %461 = vst [vmem:[%s188_s29 + $0x10] sm:$0xff] %v349_v40  ;;  %462 = vst [vmem:[%s188_s29 + $0x18] sm:$0xff] %v355_v41 }
 0x211   : > { %590 = shalt.err (!%p587_p2)
}
 0x212   : > { %s591_s17 = scalar_lea.hbm %s807_s4, 512  ;;  %s595_s22 = scalar_lea.hbm %s854_s3, 1024 }
 0x213   : > { %p592_p4 = scmp.ne.s32.totalorder %s807_s4, %s591_s17  ;;  %p596_p9 = scmp.lt.u32.totalorder %s807_s4, %s854_s3 }
 0x214   : > { %p597_p1 = scmp.lt.u32.totalorder %s595_s22, %s591_s17  ;;  %p599_p6 = scmp.lt.u32.totalorder %s591_s17, %s807_s4 }
 0x215   : > { %p593_p5 = pnand %p592_p4, %p861_p11 }
 0x216   : > { %p598_p3 = por %p597_p1, %p596_p9 }
 0x217   : > { %p594_p7 = pneg %p593_p5 }
 0x218   : > { %p600_p12 = por %p599_p6, %p598_p3 }
 0x21a   : > { %p601_p13 = pnand %p600_p12, %p594_p7 }
 0x21c   : > { %604 = shalt.err (!%p601_p13)
}
 0x21d   : > { %s654_s28 = smov 128   ;;  %s655_s29 = smov 8  }
 0x21e   : > { %482 = dma.vmem_to_hbm [thread:$0]  (%p861_p11), %s802_s30, 512, %s807_s4, %s363_s16, %s654_s28, %s654_s28, %s655_s29  }
 0x21f PF: > { %s392_s9 = sand.u32 1, %s631_s12   ;;  %p862_p8 = scmp.ne.s32.totalorder %s859_s25, 0 }
 0x220   : > { %p863_p10 = scmp.ge.s32.totalorder %s643_s15, 2  ;;  %s393_s10 = scalar_lea.sflag [#allocation6], %s392_s9 }
 0x222   : > { %p489_p0 = pnand %p863_p10, %p862_p8 }
 0x224   : > { %626 = dma.done.wait (!%p489_p0), %s393_s10, 512  }
 0x225   : > { %628 = vsyncadd (!%p489_p0), %s393_s10, 4294966784  ;;  %p16_p2 = scmp.ge.s32.totalorder %s701_s18, 4   ;;  %s864_s12 = smov %s635_s13 }
 0x226   : > { %s865_s13 = smov %s639_s14  ;;  %s866_s14 = smov %s713_s21 }
 0x227   : > { %s867_s15 = smov %s701_s18  ;;  %18 = sbr.rel (!%p16_p2) target bundleno = 5 (0x5), region = 79 }
 0x22e   :  { %398 = vsyncpa [#allocation5], 1 }
 0x22f   :  { %400 = vsyncpa [#allocation5 + $0x1], 1 }
 0x230   :  { %401 = vsyncpa [#allocation6], 1 }
 0x231   :  { %403 = vsyncpa [#allocation6 + $0x1], 1 }

</bundles_post_ra>
